<compile_context>
chip_gen: v6e
topology: v6e:2x2x1
jax: 0.10.0
libtpu: 0.0.40
codegen_flags: <defaults>
</compile_context>

<pallas_src>
import jax
import jax.numpy as jnp
from jax.experimental import pallas as pl
from jax.experimental.pallas import tpu as pltpu


def _round_up(x, m):
    return ((x + m - 1) // m) * m


# ----------------------------------------------------------------------------
# Pallas kernel: compute_segment_vectors + compute_document_vector + MLP head
# ----------------------------------------------------------------------------
def maqa_kernel(vec_ref, mask_ref, w1a_ref, w1b_ref, b1_ref, w2_ref, b2_ref,
                logits_ref,
                m_cls, l_cls, m_avg, l_avg):
    # vec_ref : (1, L, H) bf16 -- one segment of BERT last_hidden_state
    # mask_ref: (1, 1, L) bf16 -- attention mask for that segment
    # scratch : four (1, H) f32 online-LSE accumulators (max / sum-of-exp
    #           for the CLS half and the AVG half of the segment vector)
    s = pl.program_id(0)

    @pl.when(s == 0)
    def _init():
        m_cls[...] = jnp.full_like(m_cls, -jnp.inf)
        l_cls[...] = jnp.zeros_like(l_cls)
        m_avg[...] = jnp.full_like(m_avg, -jnp.inf)
        l_avg[...] = jnp.zeros_like(l_avg)

    vec = vec_ref[0]                         # (L, H) bf16
    mask = mask_ref[0]                       # (1, L) bf16

    # --- compute_segment_vectors (this segment) ------------------------------
    # Masked sum over tokens as an MXU contraction (bf16 x bf16 -> f32 acc).
    sum_vec = jnp.dot(mask, vec, preferred_element_type=jnp.float32)   # (1, H)
    n_tok = jnp.sum(mask.astype(jnp.float32), axis=1, keepdims=True)   # (1, 1)
    n_tok = jnp.maximum(n_tok, 1.0)          # guard all-padding segments
    avg = sum_vec * pl.reciprocal(n_tok, approx=False)                 # (1, H)
    cls = vec[0:1, :].astype(jnp.float32)    # (1, H)  CLS token

    # --- compute_document_vector: streaming logsumexp over segments ----------
    def lse_update(m_ref, l_ref, x):
        m_prev = m_ref[...]
        m_new = jnp.maximum(m_prev, x)
        l_ref[...] = l_ref[...] * jnp.exp(m_prev - m_new) + jnp.exp(x - m_new)
        m_ref[...] = m_new

    lse_update(m_cls, l_cls, cls)
    lse_update(m_avg, l_avg, avg)

    # --- compute_logits_by_mlp: Linear(2H,2H) -> ReLU -> Linear(2H,A) --------
    # TODO(synk): dropout layers of make_mlp are identity at inference and are
    # omitted here.
    @pl.when(s == pl.num_programs(0) - 1)
    def _finalize():
        doc_cls = m_cls[...] + jnp.log(l_cls[...])      # (1, H)
        doc_avg = m_avg[...] + jnp.log(l_avg[...])      # (1, H)
        # doc @ W1 == doc_cls @ W1[:H] + doc_avg @ W1[H:]  (keep the split —
        # it avoids an in-kernel lane concat; do not "clean up" into a concat)
        h = (jnp.dot(doc_cls, w1a_ref[...], preferred_element_type=jnp.float32)
             + jnp.dot(doc_avg, w1b_ref[...], preferred_element_type=jnp.float32)
             + b1_ref[...])                             # (1, hid_p)
        h = jnp.maximum(h, 0.0)
        logits_ref[...] = (
            jnp.dot(h, w2_ref[...], preferred_element_type=jnp.float32)
            + b2_ref[...])                              # (1, a_p) lane-dense


def _vmem_limit_bytes(L, H, hid_p, a_p):
    # Explicit, generation-portable VMEM budget (v7x: 64 MiB physical,
    # 32 MiB default scoped).  Double-buffered bf16 activation tiles + f32
    # weights + scratch, with 2x headroom, clamped to [16 MiB, 48 MiB].
    tile = L * H * 2 + L * 2                       # bf16 vec + mask tile
    weights = (2 * H * hid_p + hid_p + hid_p * a_p + a_p) * 4
    scratch = 4 * H * 4 + a_p * 4
    est = 2 * tile + 2 * weights + scratch
    return int(min(48 * 2**20, max(16 * 2**20, 2 * est)))


def maqa_logits_pallas(segments_vec_bf16, segments_mask, params):
    S, L, H = segments_vec_bf16.shape
    A = params["w2"].shape[1]
    H2 = 2 * H
    hid_p = _round_up(H2, 128)   # lane-dense hidden width of the MLP head
    a_p = _round_up(A, 128)      # lane-dense output width (unmasked vst)

    # Split W1 along its input axis (matches the CLS/AVG split) and zero-pad
    # the head to lane-dense widths.  Zero padding is exact: relu(0)=0 and the
    # padded rows/cols of W2/b2 contribute nothing; padded logits are sliced.
    w1 = params["w1"].astype(jnp.float32)                       # (2H, 2H)
    w1a = jnp.zeros((H, hid_p), jnp.float32).at[:, :H2].set(w1[:H, :])
    w1b = jnp.zeros((H, hid_p), jnp.float32).at[:, :H2].set(w1[H:, :])
    b1 = jnp.zeros((1, hid_p), jnp.float32).at[:, :H2].set(
        params["b1"].astype(jnp.float32)[None, :])
    w2p = jnp.zeros((hid_p, a_p), jnp.float32).at[:H2, :A].set(
        params["w2"].astype(jnp.float32))
    b2p = jnp.zeros((1, a_p), jnp.float32).at[:, :A].set(
        params["b2"].astype(jnp.float32)[None, :])

    # (S, 1, L) so each per-segment block's trailing two dims equal full dims.
    mask3 = segments_mask.astype(jnp.bfloat16).reshape(S, 1, L)

    logits_p = pl.pallas_call(
        maqa_kernel,
        out_shape=jax.ShapeDtypeStruct((1, a_p), jnp.float32),
        grid=(S,),
        in_specs=[
            pl.BlockSpec((1, L, H), lambda s: (s, 0, 0)),     # streamed
            pl.BlockSpec((1, 1, L), lambda s: (s, 0, 0)),     # streamed
            pl.BlockSpec((H, hid_p), lambda s: (0, 0)),       # VMEM-resident
            pl.BlockSpec((H, hid_p), lambda s: (0, 0)),
            pl.BlockSpec((1, hid_p), lambda s: (0, 0)),
            pl.BlockSpec((hid_p, a_p), lambda s: (0, 0)),
            pl.BlockSpec((1, a_p), lambda s: (0, 0)),
        ],
        out_specs=pl.BlockSpec((1, a_p), lambda s: (0, 0)),
        scratch_shapes=[
            pltpu.VMEM((1, H), jnp.float32),   # m_cls
            pltpu.VMEM((1, H), jnp.float32),   # l_cls
            pltpu.VMEM((1, H), jnp.float32),   # m_avg
            pltpu.VMEM((1, H), jnp.float32),   # l_avg
        ],
        compiler_params=pltpu.CompilerParams(
            # Segment axis carries the running-LSE accumulator -> serial.
            # TODO(synk): for large S on v7x, add a leading size-2 "parallel"
            # core axis with partial (max, sumexp) outputs combined outside.
            dimension_semantics=("arbitrary",),
            vmem_limit_bytes=_vmem_limit_bytes(L, H, hid_p, a_p)),
    )(segments_vec_bf16, mask3, w1a, w1b, b1, w2p, b2p)

    return logits_p[:, :A]


# ----------------------------------------------------------------------------
# Synthetic encoder stand-in for the pretrained BERT (encode_tokens)
# ----------------------------------------------------------------------------
def synthetic_encode_tokens(params, segments_id, segments_mask,
                            segments_token_type_id):
    # TODO(synk): the pretrained HF BERT transformer stack has no clean Pallas
    # equivalent here; a deterministic embedding-sum encoder produces the
    # (n_segments, max_seg_len, hidden_dim) last_hidden_state stand-in.
    # Emitted in bf16 so the HBM round trip into the pooling kernel is halved.
    # TODO(synk): fusing the embedding gather + tanh into the Pallas kernel
    # (scalar-prefetched token ids) would remove this round trip entirely.
    word = params["word_emb"][segments_id]                 # (S, L, H)
    ttype = params["type_emb"][segments_token_type_id]     # (S, L, H)
    pos = params["pos_emb"][None, :, :]                    # (1, L, H)
    del segments_mask
    return jnp.tanh(word + ttype + pos).astype(jnp.bfloat16)


# ----------------------------------------------------------------------------
# Full forward (mirrors MAQAModel.forward)
# ----------------------------------------------------------------------------
def maqa_forward(params, segments_id, segments_mask, segments_token_type_id,
                 compute_loss, gold_answer_labels=None):
    segments_vec = synthetic_encode_tokens(
        params, segments_id, segments_mask, segments_token_type_id)
    logits = maqa_logits_pallas(segments_vec, segments_mask, params)  # (1, A)

    if not compute_loss:
        return {"logits": logits}

    # CrossEntropyLoss(reduction='none') then .sum()  (glue on (1, A) logits)
    gold = gold_answer_labels.astype(jnp.int32)                     # (1,)
    lse = jax.nn.logsumexp(logits, axis=1)                          # (1,)
    gold_logit = jnp.take_along_axis(logits, gold[:, None], axis=1)[:, 0]
    loss = jnp.sum(lse - gold_logit)
    pred = jnp.argmax(logits, axis=1)
    acc = jnp.sum((pred == gold).astype(jnp.float32))
    return {"logits": logits, "loss": loss, "acc": acc}


# ----------------------------------------------------------------------------
# Deterministic parameter init
# ----------------------------------------------------------------------------
def init_params(key, vocab_size, max_seg_len, hidden_dim, n_answers):
    k = jax.random.split(key, 7)
    H = hidden_dim
    return {
        # synthetic encoder embeddings
        "word_emb": 0.1 * jax.random.normal(k[0], (vocab_size, H), jnp.float32),
        "type_emb": 0.1 * jax.random.normal(k[1], (2, H), jnp.float32),
        "pos_emb": 0.1 * jax.random.normal(k[2], (max_seg_len, H), jnp.float32),
        # MLP head: Linear(2H, 2H) -> ReLU -> Linear(2H, n_answers)
        "w1": 0.1 * jax.random.normal(k[3], (2 * H, 2 * H), jnp.float32),
        "b1": 0.01 * jax.random.normal(k[4], (2 * H,), jnp.float32),
        "w2": 0.1 * jax.random.normal(k[5], (2 * H, n_answers), jnp.float32),
        "b2": 0.01 * jax.random.normal(k[6], (n_answers,), jnp.float32),
    }


if __name__ == "__main__":
    # Small shapes consistent with the module's forward:
    #   segments_id / mask / token_type_id : (n_segments, max_seg_len)
    #   hidden_dim H, n_answers = len(vocab_answer) = 2 (Yes / No)
    S, L, H = 4, 16, 32
    VOCAB = 64
    N_ANSWERS = 2   # vocab_answer = {"No": 0, "Yes": 1}

    key = jax.random.PRNGKey(0)
    k_params, k_ids, k_tt, k_len = jax.random.split(key, 4)

    params = init_params(k_params, VOCAB, L, H, N_ANSWERS)

    segments_id = jax.random.randint(k_ids, (S, L), 0, VOCAB, dtype=jnp.int32)
    segments_token_type_id = jax.random.randint(k_tt, (S, L), 0, 2,
                                                dtype=jnp.int32)
    # Variable-length segments -> padding mask (at least 4 real tokens each).
    lengths = jax.random.randint(k_len, (S,), 4, L + 1, dtype=jnp.int32)
    segments_mask = (jnp.arange(L)[None, :] < lengths[:, None]).astype(jnp.int32)
    gold_answer_labels = jnp.array([1], dtype=jnp.int32)

    out = maqa_forward(params, segments_id, segments_mask,
                       segments_token_type_id, compute_loss=True,
                       gold_answer_labels=gold_answer_labels)
    jax.block_until_ready(out)

    # Reference check in plain JAX (same math as the PyTorch forward), using
    # the same bf16-rounded encoder output with f32 accumulation downstream.
    vec = synthetic_encode_tokens(params, segments_id, segments_mask,
                                  segments_token_type_id).astype(jnp.float32)
    mask_f = segments_mask.astype(jnp.float32)
    cls = vec[:, 0, :]
    denom = jnp.maximum(mask_f.sum(1, keepdims=True), 1.0)
    avg = (vec * mask_f[:, :, None]).sum(1) / denom
    segvecs = jnp.concatenate([cls, avg], axis=1)
    doc = jax.nn.logsumexp(segvecs, axis=0, keepdims=True)
    h_ref = jnp.maximum(doc @ params["w1"] + params["b1"][None, :], 0.0)
    logits_ref = h_ref @ params["w2"] + params["b2"][None, :]
    assert jnp.allclose(out["logits"], logits_ref, atol=1e-4, rtol=1e-4), (
        out["logits"], logits_ref)

    print("KERNEL_OK")
</pallas_src>

<mosaic_0001>
module attributes {stable_mosaic.version = 11 : i64} {
  func.func @maqa_kernel(%arg0: i32, %arg1: memref<1x16x32xbf16, #tpu.memory_space<vmem>>, %arg2: memref<1x1x16xbf16, #tpu.memory_space<vmem>>, %arg3: memref<32x128xf32, #tpu.memory_space<vmem>>, %arg4: memref<32x128xf32, #tpu.memory_space<vmem>>, %arg5: memref<1x128xf32, #tpu.memory_space<vmem>>, %arg6: memref<128x128xf32, #tpu.memory_space<vmem>>, %arg7: memref<1x128xf32, #tpu.memory_space<vmem>>, %arg8: memref<1x128xf32, #tpu.memory_space<vmem>>, %arg9: memref<1x32xf32, #tpu.memory_space<vmem>>, %arg10: memref<1x32xf32, #tpu.memory_space<vmem>>, %arg11: memref<1x32xf32, #tpu.memory_space<vmem>>, %arg12: memref<1x32xf32, #tpu.memory_space<vmem>>) attributes {dimension_semantics = [#tpu.dimension_semantics<arbitrary>], iteration_bounds = array<i64: 4>, scalar_prefetch = 0 : i64, scratch_operands = 4 : i64, tpu.core_type = #tpu.core_type<tc>, window_params = [{transform_indices = @transform_0, window_bounds = array<i64: 1, 16, 32>}, {transform_indices = @transform_1, window_bounds = array<i64: 1, 1, 16>}, {pipeline_mode = #tpu.pipeline_mode<synchronous>, transform_indices = @transform_2, window_bounds = array<i64: 32, 128>}, {pipeline_mode = #tpu.pipeline_mode<synchronous>, transform_indices = @transform_3, window_bounds = array<i64: 32, 128>}, {pipeline_mode = #tpu.pipeline_mode<synchronous>, transform_indices = @transform_4, window_bounds = array<i64: 1, 128>}, {pipeline_mode = #tpu.pipeline_mode<synchronous>, transform_indices = @transform_5, window_bounds = array<i64: 128, 128>}, {pipeline_mode = #tpu.pipeline_mode<synchronous>, transform_indices = @transform_6, window_bounds = array<i64: 1, 128>}, {pipeline_mode = #tpu.pipeline_mode<synchronous>, transform_indices = @transform_7, window_bounds = array<i64: 1, 128>}]} {
    %c0_i32 = arith.constant 0 : i32
    %0 = arith.cmpi eq, %arg0, %c0_i32 : i32
    %1 = arith.extui %0 : i1 to i32
    %c0_i32_0 = arith.constant 0 : i32
    %2 = arith.cmpi ne, %1, %c0_i32_0 : i32
    scf.if %2 {
      %cst_25 = arith.constant 0xFF800000 : f32
      %43 = vector.broadcast %cst_25 : f32 to vector<1x32xf32>
      %c0_26 = arith.constant 0 : index
      %c0_27 = arith.constant 0 : index
      %44 = vector.load %arg9[%c0_26, %c0_27] : memref<1x32xf32, #tpu.memory_space<vmem>>, vector<1x32xf32>
      tpu.vector_store %arg9[%c0_26, %c0_27], %43 {strides = array<i32>} : memref<1x32xf32, #tpu.memory_space<vmem>>, vector<1x32xf32>,
      %cst_28 = arith.constant 0.000000e+00 : f32
      %45 = vector.broadcast %cst_28 : f32 to vector<1x32xf32>
      %c0_29 = arith.constant 0 : index
      %c0_30 = arith.constant 0 : index
      %46 = vector.load %arg10[%c0_29, %c0_30] : memref<1x32xf32, #tpu.memory_space<vmem>>, vector<1x32xf32>
      tpu.vector_store %arg10[%c0_29, %c0_30], %45 {strides = array<i32>} : memref<1x32xf32, #tpu.memory_space<vmem>>, vector<1x32xf32>,
      %cst_31 = arith.constant 0xFF800000 : f32
      %47 = vector.broadcast %cst_31 : f32 to vector<1x32xf32>
      %c0_32 = arith.constant 0 : index
      %c0_33 = arith.constant 0 : index
      %48 = vector.load %arg11[%c0_32, %c0_33] : memref<1x32xf32, #tpu.memory_space<vmem>>, vector<1x32xf32>
      tpu.vector_store %arg11[%c0_32, %c0_33], %47 {strides = array<i32>} : memref<1x32xf32, #tpu.memory_space<vmem>>, vector<1x32xf32>,
      %cst_34 = arith.constant 0.000000e+00 : f32
      %49 = vector.broadcast %cst_34 : f32 to vector<1x32xf32>
      %c0_35 = arith.constant 0 : index
      %c0_36 = arith.constant 0 : index
      %50 = vector.load %arg12[%c0_35, %c0_36] : memref<1x32xf32, #tpu.memory_space<vmem>>, vector<1x32xf32>
      tpu.vector_store %arg12[%c0_35, %c0_36], %49 {strides = array<i32>} : memref<1x32xf32, #tpu.memory_space<vmem>>, vector<1x32xf32>,
    } else {
    }
    %c0 = arith.constant 0 : index
    %c0_1 = arith.constant 0 : index
    %c0_2 = arith.constant 0 : index
    %3 = vector.load %arg1[%c0, %c0_1, %c0_2] : memref<1x16x32xbf16, #tpu.memory_space<vmem>>, vector<1x16x32xbf16>
    %4 = vector.shape_cast %3 : vector<1x16x32xbf16> to vector<16x32xbf16>
    %c0_3 = arith.constant 0 : index
    %c0_4 = arith.constant 0 : index
    %c0_5 = arith.constant 0 : index
    %5 = vector.load %arg2[%c0_3, %c0_4, %c0_5] : memref<1x1x16xbf16, #tpu.memory_space<vmem>>, vector<1x1x16xbf16>
    %6 = vector.shape_cast %5 : vector<1x1x16xbf16> to vector<1x16xbf16>
    %cst = arith.constant dense<0.000000e+00> : vector<1x32xf32>
    %7 = tpu.matmul %6, %4, %cst {dimension_numbers = #tpu.dot_dimension_numbers<[1], [0], [0], [1], [0, 0, 1, 1], [], []>} : vector<1x16xbf16>, vector<16x32xbf16>, vector<1x32xf32> -> vector<1x32xf32>
    %8 = arith.extf %6 : vector<1x16xbf16> to vector<1x16xf32>
    %cst_6 = arith.constant dense<0.000000e+00> : vector<1xf32>
    %9 = vector.multi_reduction <add>, %8, %cst_6 [1] : vector<1x16xf32> to vector<1xf32>
    %10 = vector.shape_cast %9 : vector<1xf32> to vector<1x1xf32>
    %cst_7 = arith.constant 1.000000e+00 : f32
    %11 = vector.broadcast %cst_7 : f32 to vector<1x1xf32>
    %12 = arith.maximumf %10, %11 : vector<1x1xf32>
    %13 = tpu.reciprocal %12 : vector<1x1xf32> -> vector<1x1xf32>
    %14 = vector.broadcast %13 : vector<1x1xf32> to vector<1x32xf32>
    %15 = arith.mulf %7, %14 : vector<1x32xf32>
    %16 = vector.extract_strided_slice %4 {offsets = [0, 0], sizes = [1, 32], strides = [1, 1]} : vector<16x32xbf16> to vector<1x32xbf16>
    %17 = arith.extf %16 : vector<1x32xbf16> to vector<1x32xf32>
    %c0_8 = arith.constant 0 : index
    %c0_9 = arith.constant 0 : index
    %18 = vector.load %arg9[%c0_8, %c0_9] : memref<1x32xf32, #tpu.memory_space<vmem>>, vector<1x32xf32>
    %19 = arith.maximumf %18, %17 : vector<1x32xf32>
    %c0_10 = arith.constant 0 : index
    %c0_11 = arith.constant 0 : index
    %20 = vector.load %arg10[%c0_10, %c0_11] : memref<1x32xf32, #tpu.memory_space<vmem>>, vector<1x32xf32>
    %21 = arith.subf %18, %19 : vector<1x32xf32>
    %22 = math.exp %21 : vector<1x32xf32>
    %23 = arith.mulf %20, %22 : vector<1x32xf32>
    %24 = arith.subf %17, %19 : vector<1x32xf32>
    %25 = math.exp %24 : vector<1x32xf32>
    %26 = arith.addf %23, %25 : vector<1x32xf32>
    %c0_12 = arith.constant 0 : index
    %c0_13 = arith.constant 0 : index
    %27 = vector.load %arg10[%c0_12, %c0_13] : memref<1x32xf32, #tpu.memory_space<vmem>>, vector<1x32xf32>
    tpu.vector_store %arg10[%c0_12, %c0_13], %26 {strides = array<i32>} : memref<1x32xf32, #tpu.memory_space<vmem>>, vector<1x32xf32>,
    %c0_14 = arith.constant 0 : index
    %c0_15 = arith.constant 0 : index
    %28 = vector.load %arg9[%c0_14, %c0_15] : memref<1x32xf32, #tpu.memory_space<vmem>>, vector<1x32xf32>
    tpu.vector_store %arg9[%c0_14, %c0_15], %19 {strides = array<i32>} : memref<1x32xf32, #tpu.memory_space<vmem>>, vector<1x32xf32>,
    %c0_16 = arith.constant 0 : index
    %c0_17 = arith.constant 0 : index
    %29 = vector.load %arg11[%c0_16, %c0_17] : memref<1x32xf32, #tpu.memory_space<vmem>>, vector<1x32xf32>
    %30 = arith.maximumf %29, %15 : vector<1x32xf32>
    %c0_18 = arith.constant 0 : index
    %c0_19 = arith.constant 0 : index
    %31 = vector.load %arg12[%c0_18, %c0_19] : memref<1x32xf32, #tpu.memory_space<vmem>>, vector<1x32xf32>
    %32 = arith.subf %29, %30 : vector<1x32xf32>
    %33 = math.exp %32 : vector<1x32xf32>
    %34 = arith.mulf %31, %33 : vector<1x32xf32>
    %35 = arith.subf %15, %30 : vector<1x32xf32>
    %36 = math.exp %35 : vector<1x32xf32>
    %37 = arith.addf %34, %36 : vector<1x32xf32>
    %c0_20 = arith.constant 0 : index
    %c0_21 = arith.constant 0 : index
    %38 = vector.load %arg12[%c0_20, %c0_21] : memref<1x32xf32, #tpu.memory_space<vmem>>, vector<1x32xf32>
    tpu.vector_store %arg12[%c0_20, %c0_21], %37 {strides = array<i32>} : memref<1x32xf32, #tpu.memory_space<vmem>>, vector<1x32xf32>,
    %c0_22 = arith.constant 0 : index
    %c0_23 = arith.constant 0 : index
    %39 = vector.load %arg11[%c0_22, %c0_23] : memref<1x32xf32, #tpu.memory_space<vmem>>, vector<1x32xf32>
    tpu.vector_store %arg11[%c0_22, %c0_23], %30 {strides = array<i32>} : memref<1x32xf32, #tpu.memory_space<vmem>>, vector<1x32xf32>,
    %c3_i32 = arith.constant 3 : i32
    %40 = arith.cmpi eq, %arg0, %c3_i32 : i32
    %41 = arith.extui %40 : i1 to i32
    %c0_i32_24 = arith.constant 0 : i32
    %42 = arith.cmpi ne, %41, %c0_i32_24 : i32
    scf.if %42 {
      %c0_25 = arith.constant 0 : index
      %c0_26 = arith.constant 0 : index
      %43 = vector.load %arg9[%c0_25, %c0_26] : memref<1x32xf32, #tpu.memory_space<vmem>>, vector<1x32xf32>
      %c0_27 = arith.constant 0 : index
      %c0_28 = arith.constant 0 : index
      %44 = vector.load %arg10[%c0_27, %c0_28] : memref<1x32xf32, #tpu.memory_space<vmem>>, vector<1x32xf32>
      %45 = math.log %44 : vector<1x32xf32>
      %46 = arith.addf %43, %45 : vector<1x32xf32>
      %c0_29 = arith.constant 0 : index
      %c0_30 = arith.constant 0 : index
      %47 = vector.load %arg11[%c0_29, %c0_30] : memref<1x32xf32, #tpu.memory_space<vmem>>, vector<1x32xf32>
      %c0_31 = arith.constant 0 : index
      %c0_32 = arith.constant 0 : index
      %48 = vector.load %arg12[%c0_31, %c0_32] : memref<1x32xf32, #tpu.memory_space<vmem>>, vector<1x32xf32>
      %49 = math.log %48 : vector<1x32xf32>
      %50 = arith.addf %47, %49 : vector<1x32xf32>
      %c0_33 = arith.constant 0 : index
      %c0_34 = arith.constant 0 : index
      %51 = vector.load %arg3[%c0_33, %c0_34] : memref<32x128xf32, #tpu.memory_space<vmem>>, vector<32x128xf32>
      %cst_35 = arith.constant dense<0.000000e+00> : vector<1x128xf32>
      %52 = tpu.matmul %46, %51, %cst_35 {dimension_numbers = #tpu.dot_dimension_numbers<[1], [0], [0], [1], [0, 0, 1, 1], [], []>} : vector<1x32xf32>, vector<32x128xf32>, vector<1x128xf32> -> vector<1x128xf32>
      %c0_36 = arith.constant 0 : index
      %c0_37 = arith.constant 0 : index
      %53 = vector.load %arg4[%c0_36, %c0_37] : memref<32x128xf32, #tpu.memory_space<vmem>>, vector<32x128xf32>
      %cst_38 = arith.constant dense<0.000000e+00> : vector<1x128xf32>
      %54 = tpu.matmul %50, %53, %cst_38 {dimension_numbers = #tpu.dot_dimension_numbers<[1], [0], [0], [1], [0, 0, 1, 1], [], []>} : vector<1x32xf32>, vector<32x128xf32>, vector<1x128xf32> -> vector<1x128xf32>
      %55 = arith.addf %52, %54 : vector<1x128xf32>
      %c0_39 = arith.constant 0 : index
      %c0_40 = arith.constant 0 : index
      %56 = vector.load %arg5[%c0_39, %c0_40] : memref<1x128xf32, #tpu.memory_space<vmem>>, vector<1x128xf32>
      %57 = arith.addf %55, %56 : vector<1x128xf32>
      %cst_41 = arith.constant 0.000000e+00 : f32
      %58 = vector.broadcast %cst_41 : f32 to vector<1x128xf32>
      %59 = arith.maximumf %57, %58 : vector<1x128xf32>
      %c0_42 = arith.constant 0 : index
      %c0_43 = arith.constant 0 : index
      %60 = vector.load %arg6[%c0_42, %c0_43] : memref<128x128xf32, #tpu.memory_space<vmem>>, vector<128x128xf32>
      %cst_44 = arith.constant dense<0.000000e+00> : vector<1x128xf32>
      %61 = tpu.matmul %59, %60, %cst_44 {dimension_numbers = #tpu.dot_dimension_numbers<[1], [0], [0], [1], [0, 0, 1, 1], [], []>} : vector<1x128xf32>, vector<128x128xf32>, vector<1x128xf32> -> vector<1x128xf32>
      %c0_45 = arith.constant 0 : index
      %c0_46 = arith.constant 0 : index
      %62 = vector.load %arg7[%c0_45, %c0_46] : memref<1x128xf32, #tpu.memory_space<vmem>>, vector<1x128xf32>
      %63 = arith.addf %61, %62 : vector<1x128xf32>
      %c0_47 = arith.constant 0 : index
      %c0_48 = arith.constant 0 : index
      %64 = vector.load %arg8[%c0_47, %c0_48] : memref<1x128xf32, #tpu.memory_space<vmem>>, vector<1x128xf32>
      tpu.vector_store %arg8[%c0_47, %c0_48], %63 {strides = array<i32>} : memref<1x128xf32, #tpu.memory_space<vmem>>, vector<1x128xf32>,
    } else {
    }
    return
  }
  func.func @transform_0(%arg0: i32) -> (i32, i32, i32) {
    %c0_i32 = arith.constant 0 : i32
    %c0_i32_0 = arith.constant 0 : i32
    %c0_i32_1 = arith.constant 0 : i32
    return %arg0, %c0_i32, %c0_i32_0 : i32, i32, i32
  }
  func.func @transform_1(%arg0: i32) -> (i32, i32, i32) {
    %c0_i32 = arith.constant 0 : i32
    %c0_i32_0 = arith.constant 0 : i32
    %c0_i32_1 = arith.constant 0 : i32
    return %arg0, %c0_i32, %c0_i32_0 : i32, i32, i32
  }
  func.func @transform_2(%arg0: i32) -> (i32, i32) {
    %c0_i32 = arith.constant 0 : i32
    %c0_i32_0 = arith.constant 0 : i32
    %c0_i32_1 = arith.constant 0 : i32
    return %c0_i32, %c0_i32_0 : i32, i32
  }
  func.func @transform_3(%arg0: i32) -> (i32, i32) {
    %c0_i32 = arith.constant 0 : i32
    %c0_i32_0 = arith.constant 0 : i32
    %c0_i32_1 = arith.constant 0 : i32
    return %c0_i32, %c0_i32_0 : i32, i32
  }
  func.func @transform_4(%arg0: i32) -> (i32, i32) {
    %c0_i32 = arith.constant 0 : i32
    %c0_i32_0 = arith.constant 0 : i32
    %c0_i32_1 = arith.constant 0 : i32
    return %c0_i32, %c0_i32_0 : i32, i32
  }
  func.func @transform_5(%arg0: i32) -> (i32, i32) {
    %c0_i32 = arith.constant 0 : i32
    %c0_i32_0 = arith.constant 0 : i32
    %c0_i32_1 = arith.constant 0 : i32
    return %c0_i32, %c0_i32_0 : i32, i32
  }
  func.func @transform_6(%arg0: i32) -> (i32, i32) {
    %c0_i32 = arith.constant 0 : i32
    %c0_i32_0 = arith.constant 0 : i32
    %c0_i32_1 = arith.constant 0 : i32
    return %c0_i32, %c0_i32_0 : i32, i32
  }
  func.func @transform_7(%arg0: i32) -> (i32, i32) {
    %c0_i32 = arith.constant 0 : i32
    %c0_i32_0 = arith.constant 0 : i32
    %c0_i32_1 = arith.constant 0 : i32
    return %c0_i32, %c0_i32_0 : i32, i32
  }
}

</mosaic_0001>

<bundles_post_ra>
// kernel: tpu_custom_call.1
= control target key start
LH: loop header
LB: loop body
LE: loop exit
PB: predicated region body
PF: predicated region fallthrough
CT: control target
= control target key end

     0   :  { %12 = vsyncpa [#allocation7], 0  ;;  %s1457_s0 = inlined_call_operand.hbm [shape: bf16[4,16,32], index: 0, kind: input, shape index: {}]   ;;  %s1458_s1 = inlined_call_operand.vmem [shape: bf16[4,1,16], index: 1, kind: input, shape index: {}]   ;;  %s1459_s2 = inlined_call_operand.hbm [shape: f32[32,128], index: 2, kind: input, shape index: {}]   ;;  %s1460_s3 = inlined_call_operand.hbm [shape: f32[32,128], index: 3, kind: input, shape index: {}]   ;;  %s1461_s4 = inlined_call_operand.vmem [shape: f32[1,128], index: 4, kind: input, shape index: {}]   ;;  %s1462_s5 = inlined_call_operand.hbm [shape: f32[128,128], index: 5, kind: input, shape index: {}]   ;;  %s1463_s6 = inlined_call_operand.vmem [shape: f32[1,128], index: 6, kind: input, shape index: {}]   ;;  %s1464_s7 = inlined_call_operand.hbm [shape: f32[1,128], index: 7, kind: output, shape index: {}]  }
   0x1   :  { %14 = vsyncpa [#allocation7 + $0x1], 0 }
   0x2   :  { %15 = vsyncpa [#allocation10], 0 }
   0x3   :  { %16 = vsyncpa [#allocation13], 0 }
   0x4   :  { %17 = vsyncpa [#allocation8], 0  ;;  %s1250_s24 = smov 0   ;;  %s1252_s25 = smov 0  }
   0x5   :  { %s1254_s26 = smov 0   ;;  %s1256_s27 = smov 0  }
   0x6 LB: > { %s1269_s28 = sadd.s32 4294967295, %s1193_s27   ;;  %p43_p0 = scmp.ne.s32.totalorder %s1185_s25, %s1181_s24  ;;  %s1193_s27 = sphi %s1256_s27, %s1482_s27   ;;  %s1189_s26 = sphi %s1254_s26, %s1481_s26   ;;  %s1185_s25 = sphi %s1252_s25, %s1480_s25   ;;  %s1181_s24 = sphi %s1250_s24, %s1479_s24  }
   0x7   : > { %p1465_p1 = scmp.eq.s32.totalorder %s1269_s28, 0  ;;  %p798_p2 = scmp.ge.s32.totalorder %s1193_s27, 1 }
   0x8   : > { %p206_p3 = scmp.lt.s32.totalorder %s1193_s27, 5  ;;  %s1195_s8 = smov [#allocation9]  }
   0x9   : > { %p1278_p5 = por %p1465_p1, %p43_p0  ;;  %s218_s9 = sshll.u32 %s1195_s8, 4  ;;  %s219_s9 = int_to_ptr.vmem [resolvable:$true] %s218_s9 }
   0xa   : > { %p1282_p6 = pnand %p798_p2, %p206_p3  ;;  %s1196_s11 = smov [#allocation11]  }
   0xb   : > { %s1468_s29 = scalar_select %p1278_p5, 1, 0 }
   0xc   : > { %s1469_s30 = scalar_select %p1282_p6, 1, 0 }
   0xd   : > { %p932_p7 = pneg %p1282_p6  ;;  %s231_s12 = sshll.u32 %s1196_s11, 4  ;;  %s232_s12 = int_to_ptr.vmem [resolvable:$true] %s231_s12 }
   0xe   : > { %s1197_s13 = smov [#allocation12]   ;;  %s1028_s15 = scalar_lea.vmem %s219_s9, 512 }
   0xf   : > { %p1290_p8 = pnand %p932_p7, %p1465_p1  ;;  %s247_s14 = sshll.u32 %s1197_s13, 4  ;;  %s248_s14 = int_to_ptr.vmem [resolvable:$true] %s247_s14 }
  0x10   : > { %p1029_p10 = scmp.ne.s32.totalorder %s219_s9, %s1028_s15  ;;  %p1036_p13 = scmp.lt.s32.totalorder %s219_s9, %s219_s9 }
  0x11   : > { %p1019_p9 = pneg %p1290_p8  ;;  %p1037_p0 = scmp.lt.s32.totalorder %s1028_s15, %s1028_s15 }
  0x13   : > { %p1031_p11 = pnand %p1029_p10, %p1019_p9  ;;  %p1038_p2 = por %p1037_p0, %p1036_p13 }
  0x15   : > { %p1032_p12 = pneg %p1031_p11 }
  0x17   : > { %p1039_p3 = pnand %p1038_p2, %p1032_p12 }
  0x19   : > { %1042 = shalt.err (!%p1039_p3)
}
  0x1a   : > { %s1198_s16 = smov 128   ;;  %s1199_s17 = smov 8  }
  0x1b   : > { %935 = dma.hbm_to_vmem [thread:$0]  (!%p1290_p8), %s1459_s2, 512, %s219_s9, [#allocation10], %s1198_s16, %s1198_s16, %s1199_s17  }
  0x1c   : > { %s1054_s20 = scalar_lea.vmem %s232_s12, 512  ;;  %p1062_p4 = scmp.lt.s32.totalorder %s232_s12, %s232_s12 }
  0x1d   : > { %p1055_p7 = scmp.ne.s32.totalorder %s232_s12, %s1054_s20  ;;  %p1063_p1 = scmp.lt.s32.totalorder %s1054_s20, %s1054_s20 }
  0x1f   : > { %p1057_p10 = pnand %p1055_p7, %p1019_p9  ;;  %p1064_p13 = por %p1063_p1, %p1062_p4 }
  0x21   : > { %p1058_p11 = pneg %p1057_p10 }
  0x23   : > { %p1065_p12 = pnand %p1064_p13, %p1058_p11 }
  0x25   : > { %1068 = shalt.err (!%p1065_p12)
}
  0x26   : > { %938 = dma.hbm_to_vmem [thread:$0]  (!%p1290_p8), %s1460_s3, 512, %s232_s12, [#allocation10], %s1198_s16, %s1198_s16, %s1199_s17  }
  0x27   : > { %s1080_s23 = scalar_lea.vmem %s248_s14, 2048  ;;  %p1088_p7 = scmp.lt.s32.totalorder %s248_s14, %s248_s14 }
  0x28   : > { %p1081_p0 = scmp.ne.s32.totalorder %s248_s14, %s1080_s23  ;;  %p1089_p10 = scmp.lt.s32.totalorder %s1080_s23, %s1080_s23 }
  0x2a   : > { %p1083_p2 = pnand %p1081_p0, %p1019_p9  ;;  %p1090_p5 = por %p1089_p10, %p1088_p7 }
  0x2c   : > { %p1084_p3 = pneg %p1083_p2 }
  0x2e   : > { %p1091_p1 = pnand %p1090_p5, %p1084_p3 }
  0x30   : > { %1094 = shalt.err (!%p1091_p1)
}
  0x31   : > { %941 = dma.hbm_to_vmem [thread:$0]  (!%p1290_p8), %s1462_s5, 2048, %s248_s14, [#allocation13], %s1198_s16, %s1198_s16, %s1199_s17  }
  0x32   : > { %s1321_s9 = sadd.s32 1, %s1193_s27   ;;  %s30_s12 = sadd.s32 1, %s1189_s26 }
  0x33   : > { %s27_s11 = ssub.s32 %s1193_s27, %s1321_s9  ;;  %p37_p5 = scmp.ne.s32.totalorder %s1189_s26, %s1185_s25 }
  0x34   : > { %p28_p4 = scmp.eq.s32.totalorder %s27_s11, 0  ;;  %p38_p9 = scmp.eq.s32.totalorder %s1193_s27, 0 }
  0x35   : > { %p949_p11 = scmp.lt.s32.totalorder %s1193_s27, 4  ;;  %s264_s13 = sand.u32 1, %s1189_s26  }
  0x36   : > { %s1331_s10 = scalar_select %p28_p4, %s1189_s26, %s30_s12  }
  0x37   : > { %p39_p13 = por %p38_p9, %p37_p5  ;;  %s803_s15 = sshll.u32 %s264_s13, 3 }
  0x38   : > { %s821_s18 = sshll.u32 %s1193_s27, 7  ;;  %s268_s14 = scalar_lea.vmem [#allocation6], %s803_s15 }
  0x39   : > { %s1338_s21 = scalar_lea.hbm %s1457_s0, %s821_s18  ;;  %s275_s16 = sshll.u32 %s268_s14, 4  ;;  %s1340_s16 = int_to_ptr.vmem [resolvable:$true] %s275_s16 }
  0x3a   : > { %p1342_p8 = pnand %p949_p11, %p39_p13  ;;  %s1346_s22 = scalar_lea.sflag [#allocation7], %s264_s13 }
  0x3b   : > { %s1095_s27 = scalar_lea.hbm %s1338_s21, 128  ;;  %s1100_s8 = scalar_lea.hbm %s1457_s0, 512 }
  0x3c   : > { %p1096_p12 = scmp.ne.s32.totalorder %s1338_s21, %s1095_s27  ;;  %p1097_p0 = pneg %p1342_p8 }
  0x3d   : > { %p1101_p7 = scmp.lt.s32.totalorder %s1338_s21, %s1457_s0  ;;  %p1102_p10 = scmp.lt.s32.totalorder %s1100_s8, %s1095_s27 }
  0x3e   : > { %p1098_p2 = pnand %p1097_p0, %p1096_p12 }
  0x3f   : > { %p1103_p1 = por %p1102_p10, %p1101_p7 }
  0x40   : > { %p1099_p3 = pneg %p1098_p2 }
  0x42   : > { %p1104_p4 = pnand %p1103_p1, %p1099_p3 }
  0x44   : > { %1107 = shalt.err (!%p1104_p4)
}
  0x45   : > { %s1108_s13 = scalar_lea.vmem %s1340_s16, 128  ;;  %s1200_s15 = smov [#allocation6]  }
  0x46   : > { %p1109_p5 = scmp.ne.s32.totalorder %s1340_s16, %s1108_s13  ;;  %s1113_s18 = sshll.u32 %s1200_s15, 4  ;;  %s1114_s18 = int_to_ptr.vmem [resolvable:$false] %s1113_s18 }
  0x47   : > { %s1115_s19 = scalar_lea.vmem %s1114_s18, 256  ;;  %p1116_p13 = scmp.lt.s32.totalorder %s1340_s16, %s1114_s18 }
  0x48   : > { %p1111_p9 = pnand %p1109_p5, %p1097_p0  ;;  %p1117_p12 = scmp.lt.s32.totalorder %s1115_s19, %s1108_s13 }
  0x4a   : > { %p1112_p11 = pneg %p1111_p9  ;;  %p1118_p2 = por %p1117_p12, %p1116_p13 }
  0x4c   : > { %p1119_p6 = pnand %p1118_p2, %p1112_p11 }
  0x4e   : > { %1122 = shalt.err (!%p1119_p6)
}
  0x4f   : > { %s1201_s20 = smov 64   ;;  %s1202_s14 = smov 4  }
  0x50   : > { %945 = dma.hbm_to_vmem [thread:$0]  (!%p1342_p8), %s1338_s21, 128, %s1340_s16, %s1346_s22, %s1201_s20, %s1201_s20, %s1202_s14  }
  0x51   : > { %p1472_p0 = scmp.ne.s32.totalorder %s1469_s30, 0 }
  0x52   : > { %s295_s27 = sand.u32 (!%p1472_p0), 1, %s1185_s25   ;;  %p1473_p3 = scmp.ne.s32.totalorder (!%p1472_p0), %s1468_s29, 0 }
  0x53   : > { %293 = sbr.rel (%p1472_p0) target bundleno = 774 (0x306), region = 48  ;;  %s807_s23 = sshll.u32 (!%p1472_p0), %s295_s27, 3 }
  0x54   : > { %s296_s24 = scalar_lea.sflag (!%p1472_p0), [#allocation7], %s295_s27  ;;  %s299_s8 = scalar_lea.vmem (!%p1472_p0), [#allocation6], %s807_s23 }
  0x58   : > { %1164 = dma.done.wait (%p1473_p3), %s296_s24, 128  }
  0x59   : > { %1166 = vsyncadd (%p1473_p3), %s296_s24, 4294967168  ;;  %p1474_p6 = scmp.eq.s32.totalorder %s1269_s28, 0 }
  0x5b   : > { %1168 = dma.done.wait (%p1474_p6), [#allocation10], 1024   ;;  %p1475_p7 = pmov %p1474_p6 }
  0x5c   : > { %p1476_p8 = pmov %p1474_p6 }
  0x5d   : > { %1170 = vsyncadd (%p1475_p7), [#allocation10], 4294966272 }
  0x5e   : > { %1172 = dma.done.wait (%p1476_p8), [#allocation13], 2048   ;;  %p1477_p10 = pmov %p1474_p6 }
  0x5f   : > { %p340_p1 = scmp.lt.s32.totalorder %s1269_s28, 3  ;;  %p1478_p4 = scmp.ne.s32.totalorder %s1269_s28, 0 }
  0x60   : > { %1174 = vsyncadd (%p1477_p10), [#allocation13], 4294965248 }
  0x61   : > { %s341_s30 = scalar_select %p340_p1, %s1269_s28, 3 }
  0x62   : > { %347 = sbr.rel (%p1478_p4) target bundleno = 106 (0x6a), region = 68 }
  0x63   : > { %s342_s29 = scalar_lea.vmem %s1458_s1, %s341_s30 }
  0x67   : > { %vm348_vm0 = vcmask 253952   ;;  %v1203_v0 = vmov -inf   ;;  %v1204_v1 = vmov 0.0  }
  0x68   : > { %349 = vst.msk [vmem:[#allocation2] sm:$0x1] %vm348_vm0, %v1203_v0  ;;  %351 = vst.msk [vmem:[#allocation4] sm:$0x1] %vm348_vm0, %v1203_v0 }
  0x69   : > { %350 = vst.msk [vmem:[#allocation3] sm:$0x1] %vm348_vm0, %v1204_v1  ;;  %352 = vst.msk [vmem:[#allocation5] sm:$0x1] %vm348_vm0, %v1204_v1 }
  0x6a PF: > { %v353_v2 = vld [vmem:[%s299_s8] sm:$0xff]   ;;  %v1205_v4 = vmov 0.0   ;;  %v355_v6 = vld [vmem:[%s342_s29] sm:$0x1]  ;;  %vm1206_vm1 = vmmov 0   ;;  %vm407_vm2 = vcmask 122880  }
  0x6b   : > { %851 = vmatprep.subr.bf16.mxu0 %v1205_v4  ;;  %v414_v5 = vunpack.c.l.bf16 %v353_v2  ;;  %853 = vmatprep.mubr.msk.bf16.mxu0 %vm1206_vm1, %v1205_v4  ;;  %v406_v7 = vunpack.c.l.bf16 %v355_v6  ;;  %vm362_vm3 = vcmask 130048   ;;  %vm426_vm4 = vcmask 253952   ;;  %p814_p5 = scmp.ne.s32.totalorder %s1269_s28, 3 }
  0x6c   : > { %852 = vmatpush3.bf16.msra.mxu0 %v353_v2 }
  0x6d   : > { %v408_v9 = vsel %vm407_vm2, %v406_v7, 0.0 }
  0x6e   : > { %409 = vadd.xlane.f32.xlu0 %v408_v9 }
  0x6f   : > { %v415_v3 = vld [vmem:[#allocation2] sm:$0x1]  ;;  %854 = vmatmul.mubr.msk.bf16.vlgmr.msra.gmra.mxu0 %vm362_vm3, %v355_v6  ;;  %v429_v23 = vld [vmem:[#allocation4] sm:$0x1] }
  0x70   : > { %v416_v8 = vmax.f32 %v415_v3, %v414_v5  ;;  %v417_v14 = vld [vmem:[#allocation3] sm:$0x1]  ;;  %v431_v33 = vld [vmem:[#allocation5] sm:$0x1] }
  0x72   : > { %v418_v10 = vsub.f32 %v415_v3, %v416_v8  ;;  %v422_v11 = vsub.f32 %v414_v5, %v416_v8  ;;  %428 = vst.msk [vmem:[#allocation2] sm:$0x1] %vm426_vm4, %v416_v8 }
  0x74   : > { %v419_v12 = vmul.f32 1.442695, %v418_v10  ;;  %v423_v13 = vmul.f32 1.442695, %v422_v11 }
  0x76   : > { %1003 = vpow2.f32 %v419_v12 }
  0x77   : > { %1005 = vpow2.f32 %v423_v13 }
  0x83   : > { %v1004_v15 = vpop.eup %1003 }
  0x84   : > { %v1006_v16 = vpop.eup %1005  ;;  %v421_v17 = vmul.f32 %v1004_v15, %v417_v14 }
  0x86   : > { %v425_v18 = vadd.f32 %v1006_v16, %v421_v17 }
  0x88   : > { %427 = vst.msk [vmem:[#allocation3] sm:$0x1] %vm426_vm4, %v425_v18 }
  0xf7   : > { %v410_v19 = vpop.xlane.xlu0 %409 }
  0xf8   : > { %v411_v20 = vmax.f32 %v410_v19, 1.0 }
  0xfa   : > { %1007 = vrcp.f32 %v411_v20 }
 0x107   : > { %v1008_v21 = vpop.eup %1007 }
 0x12f   : > { %v400_v22 = vpop.f32.mrf.mxu0 }
 0x130   : > { %v413_v24 = vmul.f32 %v1008_v21, %v400_v22 }
 0x131   : > { %v855_v25 = vpop.f32.mrf.mxu0 }
 0x132   : > { %v430_v26 = vmax.f32 %v429_v23, %v413_v24 }
 0x133   : > { %v403_v27 = vpop.f32.mrf.mxu0 }
 0x134   : > { %v432_v28 = vsub.f32 %v429_v23, %v430_v26  ;;  %v436_v29 = vsub.f32 %v413_v24, %v430_v26  ;;  %441 = vst.msk [vmem:[#allocation4] sm:$0x1] %vm426_vm4, %v430_v26 }
 0x135   : > { %v856_v30 = vpop.f32.mrf.mxu0 }
 0x136   : > { %v433_v31 = vmul.f32 1.442695, %v432_v28  ;;  %v437_v32 = vmul.f32 1.442695, %v436_v29 }
 0x138   : > { %1009 = vpow2.f32 %v433_v31 }
 0x139   : > { %1011 = vpow2.f32 %v437_v32 }
 0x145   : > { %v1010_v34 = vpop.eup %1009 }
 0x146   : > { %v435_v35 = vmul.f32 %v1010_v34, %v431_v33  ;;  %v1012_v36 = vpop.eup %1011  ;;  %445 = sbr.rel (%p814_p5) target bundleno = 759 (0x2f7), region = 72 }
 0x148   : > { %v439_v37 = vadd.f32 %v1012_v36, %v435_v35 }
 0x14a   : > { %440 = vst.msk [vmem:[#allocation5] sm:$0x1] %vm426_vm4, %v439_v37 }
 0x14b   : > { %v463_v38 = vld [vmem:[#allocation11 + $0x18] sm:$0xff]  ;;  %v1207_v39 = vmov 0.0   ;;  %v462_v40 = vld [vmem:[#allocation11 + $0x10] sm:$0xff]  ;;  %vm1208_vm5 = vmmov 0   ;;  %v461_v42 = vld [vmem:[#allocation11 + $0x8] sm:$0xff]  ;;  %vm464_vm6 = vcmask 261120  }
 0x14c   : > { %857 = vmatprep.subr.mxu1 %v1207_v39  ;;  %865 = vmatprep.mubr.msk.f32.mxu1 %vm1208_vm5, %v1207_v39  ;;  %v447_v43 = vld [vmem:[#allocation3] sm:$0x1]  ;;  %v629_v44 = vld [vmem:[#allocation12 + $0x78] sm:$0xff]  ;;  %v628_v45 = vld [vmem:[#allocation12 + $0x70] sm:$0xff] }
 0x14d   : > { %858 = vmatpush3.msra.mxu1 %v463_v38  ;;  %879 = vmatprep.subr.mxu0 %v1207_v39  ;;  %v460_v46 = vld [vmem:[#allocation11] sm:$0xff]  ;;  %v627_v47 = vld [vmem:[#allocation12 + $0x68] sm:$0xff]  ;;  %v625_v49 = vld [vmem:[#allocation12 + $0x58] sm:$0xff] }
 0x14e   : > { %859 = vmatprep.subr.mxu1 %v1207_v39  ;;  %911 = vmatprep.mubr.msk.f32.mxu0 %vm1208_vm5, %v1207_v39  ;;  %v626_v48 = vld [vmem:[#allocation12 + $0x60] sm:$0xff]  ;;  %v624_v50 = vld [vmem:[#allocation12 + $0x50] sm:$0xff]  ;;  %v623_v51 = vld [vmem:[#allocation12 + $0x48] sm:$0xff] }
 0x14f   : > { %860 = vmatpush3.msra.mxu1 %v462_v40  ;;  %880 = vmatpush3.msra.mxu0 %v629_v44  ;;  %v451_v53 = vld [vmem:[#allocation4] sm:$0x1]  ;;  %v622_v55 = vld [vmem:[#allocation12 + $0x40] sm:$0xff]  ;;  %v459_v58 = vld [vmem:[#allocation9 + $0x18] sm:$0xff] }
 0x150   : > { %861 = vmatprep.subr.mxu1 %v1207_v39  ;;  %881 = vmatprep.subr.mxu0 %v1207_v39  ;;  %v621_v59 = vld [vmem:[#allocation12 + $0x38] sm:$0xff]  ;;  %v458_v60 = vld [vmem:[#allocation9 + $0x10] sm:$0xff]  ;;  %v446_v62 = vld [vmem:[#allocation2] sm:$0x1] }
 0x151   : > { %v452_v41 = vld [vmem:[#allocation5] sm:$0x1]  ;;  %862 = vmatpush3.msra.mxu1 %v461_v42  ;;  %882 = vmatpush3.msra.mxu0 %v628_v45  ;;  %v456_v0 = vld [vmem:[#allocation9] sm:$0xff]  ;;  %v620_v2 = vld [vmem:[#allocation12 + $0x30] sm:$0xff] }
 0x152   : > { %1013 = vlog2.f32 %v452_v41  ;;  %863 = vmatprep.subr.mxu1 %v1207_v39  ;;  %883 = vmatprep.subr.mxu0 %v1207_v39  ;;  %v457_v63 = vld [vmem:[#allocation9 + $0x8] sm:$0xff]  ;;  %v618_v4 = vld [vmem:[#allocation12 + $0x20] sm:$0xff]  ;;  %v617_v5 = vld [vmem:[#allocation12 + $0x18] sm:$0xff] }
 0x153   : > { %1015 = vlog2.f32 %v447_v43  ;;  %864 = vmatpush3.msra.mxu1 %v460_v46  ;;  %884 = vmatpush3.msra.mxu0 %v627_v47  ;;  %v619_v3 = vld [vmem:[#allocation12 + $0x28] sm:$0xff]  ;;  %v616_v6 = vld [vmem:[#allocation12 + $0x10] sm:$0xff]  ;;  %v614_v8 = vld [vmem:[#allocation12] sm:$0xff] }
 0x154   : > { %868 = vmatprep.subr.mxu1 %v1207_v39  ;;  %885 = vmatprep.subr.mxu0 %v1207_v39  ;;  %v615_v7 = vld [vmem:[#allocation12 + $0x8] sm:$0xff] }
 0x155   : > { %886 = vmatpush3.msra.mxu0 %v626_v48  ;;  %v611_v12 = vld [vmem:[%s1461_s4] sm:$0x1] }
 0x156   : > { %887 = vmatprep.subr.mxu0 %v1207_v39  ;;  %v630_v17 = vld [vmem:[%s1463_s6] sm:$0x1] }
 0x157   : > { %888 = vmatpush3.msra.mxu0 %v625_v49 }
 0x158   : > { %889 = vmatprep.subr.mxu0 %v1207_v39 }
 0x159   : > { %890 = vmatpush3.msra.mxu0 %v624_v50 }
 0x15a   : > { %891 = vmatprep.subr.mxu0 %v1207_v39 }
 0x15b   : > { %892 = vmatpush3.msra.mxu0 %v623_v51 }
 0x15c   : > { %893 = vmatprep.subr.mxu0 %v1207_v39 }
 0x15d   : > { %894 = vmatpush3.msra.mxu0 %v622_v55 }
 0x15e   : > { %895 = vmatprep.subr.mxu0 %v1207_v39 }
 0x15f   : > { %v1014_v52 = vpop.eup %1013  ;;  %896 = vmatpush3.msra.mxu0 %v621_v59 }
 0x160   : > { %v454_v54 = vmul.f32 0.6931472, %v1014_v52  ;;  %v1016_v56 = vpop.eup %1015  ;;  %897 = vmatprep.subr.mxu0 %v1207_v39 }
 0x161   : > { %v449_v61 = vmul.f32 0.6931472, %v1016_v56  ;;  %898 = vmatpush3.msra.mxu0 %v620_v2 }
 0x162   : > { %v455_v57 = vadd.f32 %v454_v54, %v451_v53  ;;  %899 = vmatprep.subr.mxu0 %v1207_v39 }
 0x163   : > { %v450_v1 = vadd.f32 %v449_v61, %v446_v62  ;;  %900 = vmatpush3.msra.mxu0 %v619_v3 }
 0x164   : > { %866 = vmatmul.mubr.msk.f32.vlgmr.msra.gmra.mxu1 %vm464_vm6, %v455_v57  ;;  %901 = vmatprep.subr.mxu0 %v1207_v39 }
 0x165   : > { %869 = vmatpush3.msra.mxu1 %v459_v58  ;;  %876 = vmatprep.mubr.msk.f32.mxu1 %vm1208_vm5, %v1207_v39 }
 0x166   : > { %870 = vmatprep.subr.mxu1 %v1207_v39  ;;  %902 = vmatpush3.msra.mxu0 %v618_v4 }
 0x167   : > { %871 = vmatpush3.msra.mxu1 %v458_v60  ;;  %903 = vmatprep.subr.mxu0 %v1207_v39 }
 0x168   : > { %872 = vmatprep.subr.mxu1 %v1207_v39  ;;  %904 = vmatpush3.msra.mxu0 %v617_v5 }
 0x169   : > { %873 = vmatpush3.msra.mxu1 %v457_v63  ;;  %905 = vmatprep.subr.mxu0 %v1207_v39 }
 0x16a   : > { %874 = vmatprep.subr.mxu1 %v1207_v39  ;;  %906 = vmatpush3.msra.mxu0 %v616_v6 }
 0x16b   : > { %875 = vmatpush3.msra.mxu1 %v456_v0  ;;  %907 = vmatprep.subr.mxu0 %v1207_v39 }
 0x16c   : > { %877 = vmatmul.mubr.msk.f32.vlgmr.msra.gmra.mxu1 %vm464_vm6, %v450_v1  ;;  %908 = vmatpush3.msra.mxu0 %v615_v7 }
 0x16d   : > { %909 = vmatprep.subr.mxu0 %v1207_v39 }
 0x16e   : > { %910 = vmatpush3.msra.mxu0 %v614_v8 }
 0x224   : > { %v534_v9 = vpop.f32.mrf.mxu1 }
 0x226   : > { %v867_v10 = vpop.f32.mrf.mxu1 }
 0x22c   : > { %v607_v11 = vpop.f32.mrf.mxu1 }
 0x22d   : > { %v608_v13 = vadd.f32 %v607_v11, %v534_v9 }
 0x22e   : > { %v878_v14 = vpop.f32.mrf.mxu1 }
 0x22f   : > { %v612_v15 = vadd.f32 %v611_v12, %v608_v13 }
 0x231   : > { %v613_v16 = vmax.f32 %v612_v15, 0.0 }
 0x233   : > { %912 = vmatmul.mubr.f32.vlgmr.msra.gmra.mxu0 %v613_v16 }
 0x2f3   : > { %v697_v18 = vpop.f32.mrf.mxu0 }
 0x2f4   : > { %v698_v19 = vadd.f32 %v697_v18, %v630_v17 }
 0x2f5   : > { %v913_v20 = vpop.f32.mrf.mxu0 }
 0x2f6   : > { %701 = vst [vmem:[#allocation14] sm:$0x1] %v698_v19 }
 0x2f7 PF: > { %p953_p9 = scmp.eq.s32.totalorder %s1269_s28, 3  ;;  %s1209_s13 = smov [#allocation14]  }
 0x2f8   : > { %s709_s15 = sshll.u32 %s1209_s13, 4  ;;  %s710_s15 = int_to_ptr.vmem [resolvable:$true] %s709_s15 }
 0x2f9   : > { %s1123_s18 = scalar_lea.vmem %s710_s15, 16  ;;  %s1129_s19 = scalar_lea.vmem %s710_s15, 32 }
 0x2fa   : > { %p1124_p11 = scmp.ne.s32.totalorder %s710_s15, %s1123_s18  ;;  %p1130_p2 = scmp.lt.s32.totalorder %s710_s15, %s710_s15 }
 0x2fb   : > { %p1131_p0 = scmp.lt.s32.totalorder %s1129_s19, %s1123_s18 }
 0x2fc   : > { %p1125_p13 = pnand %p1124_p11, %p953_p9 }
 0x2fd   : > { %p1132_p3 = por %p1131_p0, %p1130_p2 }
 0x2fe   : > { %p1126_p12 = pneg %p1125_p13 }
 0x300   : > { %p1133_p6 = pnand %p1132_p3, %p1126_p12 }
 0x302   : > { %1136 = shalt.err (!%p1133_p6)
}
 0x303   : > { %929 = dma.vmem_to_hbm [thread:$0]  (%p953_p9), %s710_s15, 16, %s1464_s7, [#allocation8]  }
 0x304   : > { %1176 = dma.done.wait (%p953_p9), [#allocation8], 16  }
 0x305   : > { %1178 = vsyncadd (%p953_p9), [#allocation8], 4294967280 }
 0x306 PF: > { %p20_p7 = scmp.ge.s32.totalorder %s1321_s9, 6   ;;  %s1479_s24 = smov %s1185_s25 }
 0x307   : > { %s1480_s25 = smov %s1189_s26  ;;  %s1481_s26 = smov %s1331_s10 }
 0x308   : > { %s1482_s27 = smov %s1321_s9  ;;  %22 = sbr.rel (!%p20_p7) target bundleno = 6 (0x6), region = 108 }
 0x30d   :  { %722 = vsyncpa [#allocation7], 1 }
 0x30e   :  { %724 = vsyncpa [#allocation7 + $0x1], 1 }
 0x30f   :  { %725 = vsyncpa [#allocation10], 1 }
 0x310   :  { %726 = vsyncpa [#allocation13], 1 }
 0x311   :  { %727 = vsyncpa [#allocation8], 1 }
 0x312   :  { %729 = vsyncpa [#allocation8 + $0x1], 1 }

</bundles_post_ra>
